<compile_context>
chip_gen: v7x
topology: tpu7x:2x2x1
jax: 0.10.0
libtpu: 0.0.40
codegen_flags: <defaults>
</compile_context>

<pallas_src>
import jax
import jax.numpy as jnp
from jax import lax
from jax.experimental import pallas as pl
from jax.experimental.pallas import tpu as pltpu


def _make_gather_kernel(vocab: int, vocab_pad: int):
    """One grid step: gather `rows_per_block` table rows via a one-hot MXU matmul."""

    def kernel(idx_ref, table_ref, out_ref):
        # idx_ref:   VMEM (rows, 1) int32      (per-block indices)
        # table_ref: VMEM (V_pad, D_pad)       (resident: constant index_map)
        # out_ref:   VMEM (rows, D_pad)
        rows = out_ref.shape[0]
        idx = jnp.clip(idx_ref[...], 0, vocab - 1)                     # (rows, 1)
        cols = lax.broadcasted_iota(jnp.int32, (rows, vocab_pad), 1)   # (rows, V_pad)
        one_hot = (idx == cols).astype(table_ref.dtype)                # (rows, V_pad)
        out_ref[...] = jnp.dot(
            one_hot,
            table_ref[...],
            preferred_element_type=jnp.float32,
            precision=lax.Precision.HIGHEST,   # bit-faithful f32 gather (v5e MXU is bf16)
        ).astype(out_ref.dtype)

    return kernel


def temporal_positional_embedding(cumulative_positions, table, rows_per_block=None):
    """Pallas equivalent of `nn.Embedding(max_position+1, d_model)(cumulative_positions)`.

    cumulative_positions: int array, any shape (e.g. (B, T)).
    table:                (V, D) float embedding table.
    Returns:              cumulative_positions.shape + (D,)
    """
    V, D = table.shape
    idx_shape = cumulative_positions.shape
    idx_flat = cumulative_positions.reshape(-1).astype(jnp.int32)
    n = idx_flat.shape[0]

    # Block size: large blocks amortize per-grid-step overhead; for small n keep
    # >= 2 blocks so both v7x TensorCores get work (no-op on single-TC v5e/v6e).
    if rows_per_block is None:
        rows_per_block = 512 if n >= 1024 else max(8, pl.cdiv(n, 16) * 8)
    rows_per_block = max(8, (rows_per_block // 8) * 8)

    n_pad = pl.cdiv(n, rows_per_block) * rows_per_block
    if n_pad != n:
        idx_flat = jnp.pad(idx_flat, (0, n_pad - n))
    idx2d = idx_flat.reshape(n_pad, 1)

    # Lane-dense padding: D_pad multiple of 128 (unmasked vst), V_pad multiple of
    # 128 (whole-MXU-tile contraction). Padded table rows are zero and padded
    # index rows gather row 0; both are sliced away below.
    V_pad = pl.cdiv(V, 128) * 128
    D_pad = pl.cdiv(D, 128) * 128
    if (V_pad, D_pad) != (V, D):
        table = jnp.pad(table, ((0, V_pad - V), (0, D_pad - D)))

    grid = (n_pad // rows_per_block,)
    out_flat = pl.pallas_call(
        _make_gather_kernel(V, V_pad),
        out_shape=jax.ShapeDtypeStruct((n_pad, D_pad), table.dtype),
        grid=grid,
        in_specs=[
            # Per-block index column in VMEM: one vector load per block,
            # no per-row SMEM scalar loads.
            pl.BlockSpec((rows_per_block, 1), lambda i: (i, 0)),
            # Full padded table, constant block index -> stays resident in VMEM.
            # TODO(synk): for very large V*D (v7x has 64 MiB VMEM/TC) switch to an
            # HBM (pl.ANY) table with double-buffered make_async_copy row gathers.
            pl.BlockSpec((V_pad, D_pad), lambda i: (0, 0)),
        ],
        out_specs=pl.BlockSpec((rows_per_block, D_pad), lambda i: (i, 0)),
        compiler_params=pltpu.CompilerParams(
            dimension_semantics=("parallel",)),
    )(idx2d, table)

    return out_flat[:n, :D].reshape(*idx_shape, D)


def temporal_positional_embedding_reference(cumulative_positions, table):
    """Pure-JAX reference matching PyTorch nn.Embedding lookup."""
    return jnp.take(table, cumulative_positions, axis=0)


if __name__ == "__main__":
    # Small deterministic example consistent with the module:
    #   batch=2, seq=8 cumulative positions in [0, max_position],
    #   max_position=50 -> table has 51 rows, d_model=128.
    B, T = 2, 8
    MAX_POSITION = 50
    D_MODEL = 128

    key = jax.random.PRNGKey(0)
    k_idx, k_tab = jax.random.split(key)

    cumulative_positions = jax.random.randint(
        k_idx, (B, T), minval=0, maxval=MAX_POSITION + 1, dtype=jnp.int32)
    # nn.Embedding default init: N(0, 1)
    table = jax.random.normal(
        k_tab, (MAX_POSITION + 1, D_MODEL), dtype=jnp.float32)

    out = jax.block_until_ready(
        temporal_positional_embedding(cumulative_positions, table))
    ref = temporal_positional_embedding_reference(cumulative_positions, table)

    assert out.shape == (B, T, D_MODEL), out.shape
    # HIGHEST-precision one-hot matmul is exact up to <=1 ulp; use a tight tolerance.
    assert jnp.allclose(out, ref, rtol=1e-6, atol=1e-6), (
        "mismatch vs reference, max abs err = "
        f"{float(jnp.max(jnp.abs(out - ref)))}")

    print("KERNEL_OK")
</pallas_src>

<mosaic_0001>
module attributes {stable_mosaic.version = 11 : i64} {
  func.func @kernel(%arg0: i32, %arg1: memref<8x1xi32, #tpu.memory_space<vmem>>, %arg2: memref<128x128xf32, #tpu.memory_space<vmem>>, %arg3: memref<8x128xf32, #tpu.memory_space<vmem>>) attributes {dimension_semantics = [#tpu.dimension_semantics<parallel>], iteration_bounds = array<i64: 2>, scalar_prefetch = 0 : i64, scratch_operands = 0 : i64, tpu.core_type = #tpu.core_type<tc>, window_params = [{transform_indices = @transform_0, window_bounds = array<i64: 8, 1>}, {pipeline_mode = #tpu.pipeline_mode<synchronous>, transform_indices = @transform_1, window_bounds = array<i64: 128, 128>}, {transform_indices = @transform_2, window_bounds = array<i64: 8, 128>}]} {
    %c0 = arith.constant 0 : index
    %c0_0 = arith.constant 0 : index
    %0 = vector.load %arg1[%c0, %c0_0] : memref<8x1xi32, #tpu.memory_space<vmem>>, vector<8x1xi32>
    %c0_i32 = arith.constant 0 : i32
    %c50_i32 = arith.constant 50 : i32
    %1 = vector.broadcast %c0_i32 : i32 to vector<8x1xi32>
    %2 = arith.maxsi %1, %0 : vector<8x1xi32>
    %3 = vector.broadcast %c50_i32 : i32 to vector<8x1xi32>
    %4 = arith.minsi %3, %2 : vector<8x1xi32>
    %5 = tpu.iota {dimensions = array<i32: 1>} : vector<8x128xi32>
    %6 = vector.broadcast %4 : vector<8x1xi32> to vector<8x128xi32>
    %7 = arith.cmpi eq, %6, %5 : vector<8x128xi32>
    %8 = arith.extui %7 : vector<8x128xi1> to vector<8x128xi32>
    %9 = arith.sitofp %8 : vector<8x128xi32> to vector<8x128xf32>
    %c0_1 = arith.constant 0 : index
    %c0_2 = arith.constant 0 : index
    %10 = vector.load %arg2[%c0_1, %c0_2] : memref<128x128xf32, #tpu.memory_space<vmem>>, vector<128x128xf32>
    %cst = arith.constant dense<0.000000e+00> : vector<8x128xf32>
    %11 = tpu.matmul %9, %10, %cst {dimension_numbers = #tpu.dot_dimension_numbers<[1], [0], [0], [1], [0, 0, 1, 1], [], []>, precision = #tpu.contract_precision<fp32>} : vector<8x128xf32>, vector<128x128xf32>, vector<8x128xf32> -> vector<8x128xf32>
    %c0_3 = arith.constant 0 : index
    %c0_4 = arith.constant 0 : index
    %12 = vector.load %arg3[%c0_3, %c0_4] : memref<8x128xf32, #tpu.memory_space<vmem>>, vector<8x128xf32>
    tpu.vector_store %arg3[%c0_3, %c0_4], %11 {strides = array<i32>} : memref<8x128xf32, #tpu.memory_space<vmem>>, vector<8x128xf32>,
    return
  }
  func.func @transform_0(%arg0: i32) -> (i32, i32) {
    %c0_i32 = arith.constant 0 : i32
    %c0_i32_0 = arith.constant 0 : i32
    return %arg0, %c0_i32 : i32, i32
  }
  func.func @transform_1(%arg0: i32) -> (i32, i32) {
    %c0_i32 = arith.constant 0 : i32
    %c0_i32_0 = arith.constant 0 : i32
    %c0_i32_1 = arith.constant 0 : i32
    return %c0_i32, %c0_i32_0 : i32, i32
  }
  func.func @transform_2(%arg0: i32) -> (i32, i32) {
    %c0_i32 = arith.constant 0 : i32
    %c0_i32_0 = arith.constant 0 : i32
    return %arg0, %c0_i32 : i32, i32
  }
}

</mosaic_0001>

<bundles_post_ra>
// kernel: tpu_custom_call.1
= control target key start
LH: loop header
LB: loop body
LE: loop exit
PB: predicated region body
PF: predicated region fallthrough
CT: control target
= control target key end

     0   :  { %7 = vsyncpa [#allocation3], 0  ;;  %s2003_s0 = inlined_call_operand.vmem [shape: s32[16,1], index: 0, kind: input, shape index: {}]   ;;  %s2004_s1 = inlined_call_operand.hbm [shape: f32[128,128], index: 1, kind: input, shape index: {}]   ;;  %s2005_s2 = inlined_call_operand.hbm [shape: f32[16,128], index: 2, kind: output, shape index: {}]  }
   0x1   :  { %8 = vsyncpa [#allocation4], 0 }
   0x2   :  { %10 = vsyncpa [#allocation4 + $0x1], 0  ;;  %s1569_s9 = smov 0   ;;  %s1571_s10 = smov 0  }
   0x3   :  { %s1573_s11 = smov 0   ;;  %s1575_s12 = smov 0  }
   0x4 LB: > { %s1590_s13 = sadd.s32 4294967295, %s1543_s12   ;;  %s910_s14 = sadd.s32 4294967294, %s1543_s12   ;;  %s1543_s12 = sphi %s1575_s12, %s2021_s12   ;;  %s1539_s11 = sphi %s1573_s11, %s2020_s11   ;;  %s1535_s10 = sphi %s1571_s10, %s2019_s10   ;;  %s1531_s9 = sphi %s1569_s9, %s2018_s9  }
   0x5   : > { %s1594_s15 = sadd.s32 1, %s1543_s12   ;;  %s70_s16 = sadd.s32 1, %s1539_s11 }
   0x6   : > { %s67_s17 = ssub.s32 %s1543_s12, %s1594_s15  ;;  %p80_p0 = scmp.ne.s32.totalorder %s1539_s11, %s1535_s10 }
   0x7   : > { %p68_p1 = scmp.eq.s32.totalorder %s67_s17, 0  ;;  %p81_p2 = scmp.eq.s32.totalorder %s1590_s13, 1 }
   0x8   : > { %p86_p3 = scmp.ne.s32.totalorder %s1535_s10, %s1531_s9  ;;  %p87_p4 = scmp.eq.s32.totalorder %s910_s14, 1 }
   0x9   : > { %s1605_s18 = scalar_select %p68_p1, %s1539_s11, %s70_s16  }
   0xa   : > { %p1607_p5 = por %p81_p2, %p80_p0  ;;  %p1611_p6 = por %p87_p4, %p86_p3 }
   0xb   : > { %p911_p7 = scmp.ge.s32.totalorder %s1543_s12, 1  ;;  %p94_p8 = scmp.lt.s32.totalorder %s1543_s12, 3 }
   0xc   : > { %s2009_s19 = scalar_select %p1607_p5, 1, 0 }
   0xd   : > { %s2010_s20 = scalar_select %p1611_p6, 1, 0 }
   0xe   : > { %p2006_p9 = scmp.eq.s32.totalorder %s1590_s13, 0  ;;  %p1618_p10 = pnand %p911_p7, %p94_p8 }
   0xf   : > { %s1545_s22 = smov [#allocation2]   ;;  %s1449_s27 = scalar_lea.hbm %s2004_s1, 2048 }
  0x10   : > { %s2011_s21 = scalar_select %p1618_p10, 1, 0 }
  0x11   : > { %s106_s23 = sshll.u32 %s1545_s22, 4  ;;  %p1397_p11 = pneg %p1618_p10  ;;  %s107_s23 = int_to_ptr.vmem [resolvable:$true] %s106_s23 }
  0x12   : > { %p1450_p13 = scmp.ne.s32.totalorder %s2004_s1, %s1449_s27  ;;  %p1456_p3 = scmp.lt.u32.totalorder %s1449_s27, %s2004_s1 }
  0x13   : > { %p1626_p12 = pnand %p2006_p9, %p1397_p11 }
  0x15   : > { %p1451_p0 = pneg %p1626_p12 }
  0x17   : > { %p1452_p1 = pnand %p1451_p0, %p1450_p13 }
  0x19   : > { %p1453_p2 = pneg %p1452_p1 }
  0x1b   : > { %p1458_p4 = pnand %p1456_p3, %p1453_p2 }
  0x1d   : > { %1461 = shalt.err (!%p1458_p4)
}
  0x1e   : > { %s1462_s4 = scalar_lea.vmem %s107_s23, 2048  ;;  %p1470_p9 = scmp.lt.s32.totalorder %s107_s23, %s107_s23 }
  0x1f   : > { %p1463_p7 = scmp.ne.s32.totalorder %s107_s23, %s1462_s4  ;;  %p1471_p6 = scmp.lt.s32.totalorder %s1462_s4, %s1462_s4 }
  0x21   : > { %p1465_p8 = pnand %p1463_p7, %p1451_p0  ;;  %p1472_p5 = por %p1471_p6, %p1470_p9 }
  0x23   : > { %p1466_p11 = pneg %p1465_p8 }
  0x25   : > { %p1473_p10 = pnand %p1472_p5, %p1466_p11 }
  0x27   : > { %1476 = shalt.err (!%p1473_p10)
}
  0x28   : > { %s1546_s5 = smov 128   ;;  %s1547_s6 = smov 8  }
  0x29   : > { %1400 = dma.hbm_to_vmem [thread:$0]  (!%p1626_p12), %s2004_s1, 2048, %s107_s23, [#allocation3], %s1546_s5, %s1546_s5, %s1547_s6  }
  0x2a   : > { %p2013_p13 = scmp.ne.s32.totalorder %s2011_s21, 0 }
  0x2b   : > { %p2014_p1 = scmp.eq.s32.totalorder (!%p2013_p13), %s1590_s13, 0 }
  0x2c   : > { %129 = sbr.rel (%p2013_p13) target bundleno = 493 (0x1ed), region = 28 }
  0x33   : > { %1522 = dma.done.wait (%p2014_p1), [#allocation3], 2048   ;;  %p2015_p0 = pmov %p2014_p1 }
  0x34   : > { %p150_p5 = scmp.lt.s32.totalorder %s1590_s13, 1  ;;  %v1548_v0 = vmov 0   ;;  %v1549_v1 = vmov 0.0|0.0   ;;  %v167_v3 = vld [vmem:[#allocation2] sm:$0xff]  ;;  %v168_v4 = vld [vmem:[#allocation2 + $0x8] sm:$0xff]  ;;  %v169_v7 = vld [vmem:[#allocation2 + $0x10] sm:$0xff] }
  0x35   : > { %1524 = vsyncadd (%p2015_p0), [#allocation3], 4294965248  ;;  %1448 = vset.pattern.permute.xlu0 %v1548_v0  ;;  %1310 = vmatprep.subr.bf16.mxu0 %v1549_v1  ;;  %v184_v5 = vand.u32 4294901760, %v167_v3  ;;  %v187_v6 = vand.u32 4294901760, %v168_v4  ;;  %v170_v8 = vld [vmem:[#allocation2 + $0x18] sm:$0xff]  ;;  %v171_v9 = vld [vmem:[#allocation2 + $0x20] sm:$0xff] }
  0x36   : > { %s151_s14 = scalar_select %p150_p5, %s1590_s13, 1  ;;  %1238 = vmatprep.subr.bf16.mxu1 %v1549_v1  ;;  %v190_v11 = vand.u32 4294901760, %v169_v7  ;;  %v193_v12 = vand.u32 4294901760, %v170_v8  ;;  %v172_v13 = vld [vmem:[#allocation2 + $0x28] sm:$0xff]  ;;  %v196_v14 = vand.u32 4294901760, %v171_v9  ;;  %v173_v15 = vld [vmem:[#allocation2 + $0x30] sm:$0xff] }
  0x37   : > { %v1659_v16 = vpack.c.bf16 %v187_v6, %v184_v5  ;;  %v1661_v17 = vsub.f32 %v167_v3, %v184_v5  ;;  %v1663_v18 = vsub.f32 %v168_v4, %v187_v6  ;;  %v174_v19 = vld [vmem:[#allocation2 + $0x38] sm:$0xff]  ;;  %v1665_v20 = vld [vmem:[#allocation2 + $0x40] sm:$0xff]  ;;  %v1667_v21 = vld [vmem:[#allocation2 + $0x48] sm:$0xff]  ;;  %v199_v28 = vand.u32 4294901760, %v172_v13  ;;  %s147_s23 = sand.u32 1, %s1535_s10   ;;  %s923_s25 = sshll.u32 %s1590_s13, 7 }
  0x38   : > { %s917_s16 = sshll.u32 %s151_s14, 3  ;;  %v1669_v23 = vsub.f32 %v169_v7, %v190_v11  ;;  %v1671_v24 = vsub.f32 %v170_v8, %v193_v12  ;;  %v1673_v25 = vld [vmem:[#allocation2 + $0x50] sm:$0xff]  ;;  %v1675_v26 = vld [vmem:[#allocation2 + $0x58] sm:$0xff]  ;;  %v1678_v27 = vpack.c.bf16 %v193_v12, %v190_v11  ;;  %v1680_v29 = vsub.f32 %v171_v9, %v196_v14  ;;  %v1686_v34 = vld [vmem:[#allocation2 + $0x60] sm:$0xff]  ;;  %s916_s24 = sshll.u32 %s147_s23, 3 }
  0x39   : > { %s153_s22 = scalar_lea.vmem %s2003_s0, %s917_s16  ;;  %1312 = vmatpush3.bf16.msra.mxu0 %v1659_v16  ;;  %v202_v30 = vand.u32 4294901760, %v173_v15  ;;  %1240 = vmatpush3.bf16.msra.mxu1 %v1659_v16  ;;  %v205_v31 = vand.u32 4294901760, %v174_v19  ;;  %v208_v32 = vand.u32 4294901760, %v1665_v20  ;;  %v211_v33 = vand.u32 4294901760, %v1667_v21  ;;  %v1695_v39 = vld [vmem:[#allocation2 + $0x68] sm:$0xff]  ;;  %v1697_v40 = vld [vmem:[#allocation2 + $0x70] sm:$0xff]  ;;  %s1961_s30 = scalar_lea.hbm %s2005_s2, %s923_s25 }
  0x3a   : > { %v154_v2 = vld [vmem:[%s153_s22] sm:$0xff]  ;;  %1313 = vmatprep.subr.bf16.mxu0 %v1549_v1  ;;  %1241 = vmatprep.subr.bf16.mxu1 %v1549_v1  ;;  %v1689_v35 = vsub.f32 %v172_v13, %v199_v28  ;;  %v214_v37 = vand.u32 4294901760, %v1673_v25  ;;  %v217_v38 = vand.u32 4294901760, %v1675_v26  ;;  %v1707_v44 = vld [vmem:[#allocation2 + $0x78] sm:$0xff]  ;;  %v1710_v45 = vpack.c.bf16 %v199_v28, %v196_v14  ;;  %s149_s26 = scalar_lea.vmem [#allocation5], %s916_s24  ;;  %s826_s3 = scalar_lea.sflag [#allocation4], %s147_s23 }
  0x3b   : > { %vm155_vm0 = vcmp.gt.s32.totalorder %v154_v2, 0  ;;  %v1691_v36 = vsub.f32 %v173_v15, %v202_v30  ;;  %v1699_v41 = vsub.f32 %v174_v19, %v205_v31  ;;  %v1702_v42 = vsub.f32 %v1665_v20, %v208_v32  ;;  %s839_s27 = sshll.u32 %s149_s26, 4  ;;  %p2016_p9 = scmp.ne.s32.totalorder %s2009_s19, 0  ;;  %s1963_s27 = int_to_ptr.vmem [resolvable:$true] %s839_s27 }
  0x3c   : > { %v156_v10 = vsel %vm155_vm0, %v154_v2, 0  ;;  %v1705_v43 = vsub.f32 %v1667_v21, %v211_v33  ;;  %v1713_v46 = vsub.f32 %v1673_v25, %v214_v37  ;;  %v1716_v47 = vsub.f32 %v1675_v26, %v217_v38  ;;  %s1477_s4 = scalar_lea.vmem %s1963_s27, 128  ;;  %s1553_s13 = smov [#allocation5]  }
  0x3d   : > { %vm157_vm1 = vcmp.lt.s32.totalorder %v156_v10, 50  ;;  %1315 = vmatpush3.bf16.msra.mxu0 %v1678_v27  ;;  %v220_v48 = vand.u32 4294901760, %v1686_v34  ;;  %1243 = vmatpush3.bf16.msra.mxu1 %v1678_v27  ;;  %v223_v49 = vand.u32 4294901760, %v1695_v39  ;;  %v226_v50 = vand.u32 4294901760, %v1697_v40  ;;  %p1478_p6 = scmp.ne.s32.totalorder %s1963_s27, %s1477_s4  ;;  %s1481_s5 = sshll.u32 %s1553_s13, 4  ;;  %s1482_s5 = int_to_ptr.vmem [resolvable:$false] %s1481_s5 }
  0x3e   : > { %v158_v22 = vsel %vm157_vm1, %v156_v10, 50  ;;  %1316 = vmatprep.subr.bf16.mxu0 %v1549_v1  ;;  %1244 = vmatprep.subr.bf16.mxu1 %v1549_v1  ;;  %v229_v52 = vand.u32 4294901760, %v1707_v44  ;;  %vm1550_vm2 = vmmov 0   ;;  %v1551_v53 = vmov 0.0   ;;  %s1483_s6 = scalar_lea.vmem %s1482_s5, 256  ;;  %p1484_p2 = scmp.lt.s32.totalorder %s1963_s27, %s1482_s5 }
  0x3f   : > { %162 = vperm.xlu0 %1448, %v158_v22   ;;  %v1727_v51 = vsub.f32 %v1686_v34, %v220_v48  ;;  %1165 = vmatprep.mubr.msk.f32.mxu0 %vm1550_vm2, %v1551_v53  ;;  %v277_v54 = vand.u32 4294901760, %v1661_v17  ;;  %v284_v55 = vand.u32 4294901760, %v1663_v18  ;;  %v1734_v56 = vpack.c.bf16 %v205_v31, %v202_v30  ;;  %p1479_p10 = pnand %p1478_p6, %p2016_p9  ;;  %p1485_p3 = scmp.lt.s32.totalorder %s1483_s6, %s1477_s4 }
  0x40   : > { %v1737_v57 = vsub.f32 %v1695_v39, %v223_v49  ;;  %v1742_v58 = vsub.f32 %v1697_v40, %v226_v50  ;;  %1060 = vmatprep.mubr.msk.f32.mxu1 %vm1550_vm2, %v1551_v53  ;;  %v1750_v59 = vsub.f32 %v1707_v44, %v229_v52  ;;  %v291_v63 = vand.u32 4294901760, %v1669_v23 }
  0x41   : > { %1318 = vmatpush3.bf16.msra.mxu0 %v1710_v45  ;;  %v1752_v60 = vpack.c.bf16 %v284_v55, %v277_v54  ;;  %v278_v61 = vsub.f32 %v1661_v17, %v277_v54  ;;  %v285_v62 = vsub.f32 %v1663_v18, %v284_v55  ;;  %1246 = vmatpush3.bf16.msra.mxu1 %v1710_v45  ;;  %v298_v0 = vand.u32 4294901760, %v1671_v24  ;;  %p1480_p12 = pneg %p1479_p10  ;;  %p1486_p4 = por %p1485_p3, %p1484_p2 }
  0x42   : > { %1319 = vmatprep.subr.bf16.mxu0 %v1549_v1  ;;  %1247 = vmatprep.subr.bf16.mxu1 %v1549_v1  ;;  %v292_v5 = vsub.f32 %v1669_v23, %v291_v63  ;;  %v305_v7 = vand.u32 4294901760, %v1680_v29  ;;  %v1767_v8 = vpack.c.bf16 %v211_v33, %v208_v32  ;;  %v312_v10 = vand.u32 4294901760, %v1689_v35 }
  0x43   : > { %v279_v2 = vand.u32 4294901760, %v278_v61  ;;  %v286_v3 = vand.u32 4294901760, %v285_v62  ;;  %v1761_v4 = vpack.c.bf16 %v298_v0, %v291_v63  ;;  %v299_v6 = vsub.f32 %v1671_v24, %v298_v0  ;;  %p1487_p7 = pnand %p1486_p4, %p1480_p12 }
  0x44   : > { %v293_v11 = vand.u32 4294901760, %v292_v5  ;;  %v306_v13 = vsub.f32 %v1680_v29, %v305_v7  ;;  %v1776_v14 = vpack.c.bf16 %v312_v10, %v305_v7  ;;  %v313_v15 = vsub.f32 %v1689_v35, %v312_v10 }
  0x45   : > { %1321 = vmatpush3.bf16.msra.mxu0 %v1734_v56  ;;  %v1769_v9 = vpack.c.bf16 %v286_v3, %v279_v2  ;;  %1249 = vmatpush3.bf16.msra.mxu1 %v1734_v56  ;;  %v300_v12 = vand.u32 4294901760, %v299_v6  ;;  %v319_v21 = vand.u32 4294901760, %v1691_v36  ;;  %v326_v22 = vand.u32 4294901760, %v1699_v41 }
  0x46   : > { %1322 = vmatprep.subr.bf16.mxu0 %v1549_v1  ;;  %1250 = vmatprep.subr.bf16.mxu1 %v1549_v1  ;;  %v307_v20 = vand.u32 4294901760, %v306_v13  ;;  %v1784_v25 = vpack.c.bf16 %v217_v38, %v214_v37  ;;  %v314_v26 = vand.u32 4294901760, %v313_v15  ;;  %v333_v37 = vand.u32 4294901760, %v1702_v42 }
  0x47   : > { %v1779_v19 = vpack.c.bf16 %v300_v12, %v293_v11  ;;  %v1788_v28 = vpack.c.bf16 %v326_v22, %v319_v21  ;;  %v320_v30 = vsub.f32 %v1691_v36, %v319_v21  ;;  %v327_v31 = vsub.f32 %v1699_v41, %v326_v22 }
  0x48   : > { %v1793_v32 = vpack.c.bf16 %v314_v26, %v307_v20  ;;  %v340_v38 = vand.u32 4294901760, %v1705_v43  ;;  %v1800_v54 = vpack.c.bf16 %v223_v49, %v220_v48  ;;  %v334_v62 = vsub.f32 %v1702_v42, %v333_v37 }
  0x49   : > { %1324 = vmatpush3.bf16.msra.mxu0 %v1767_v8  ;;  %1252 = vmatpush3.bf16.msra.mxu1 %v1767_v8  ;;  %v321_v33 = vand.u32 4294901760, %v320_v30  ;;  %v328_v39 = vand.u32 4294901760, %v327_v31  ;;  %v347_v2 = vand.u32 4294901760, %v1713_v46  ;;  %v354_v34 = vand.u32 4294901760, %v1716_v47 }
  0x4a   : > { %1325 = vmatprep.subr.bf16.mxu0 %v1549_v1  ;;  %1253 = vmatprep.subr.bf16.mxu1 %v1549_v1  ;;  %v1806_v61 = vpack.c.bf16 %v340_v38, %v333_v37  ;;  %v341_v63 = vsub.f32 %v1705_v43, %v340_v38  ;;  %v335_v0 = vand.u32 4294901760, %v334_v62  ;;  %v1818_v48 = vpack.c.bf16 %v229_v52, %v226_v50 }
  0x4b   : > { %v1804_v55 = vpack.c.bf16 %v328_v39, %v321_v33  ;;  %v1822_v3 = vpack.c.bf16 %v354_v34, %v347_v2  ;;  %v348_v5 = vsub.f32 %v1713_v46, %v347_v2  ;;  %v355_v6 = vsub.f32 %v1716_v47, %v354_v34 }
  0x4c   : > { %v342_v49 = vand.u32 4294901760, %v341_v63  ;;  %v361_v44 = vand.u32 4294901760, %v1727_v51  ;;  %v368_v50 = vand.u32 4294901760, %v1737_v57  ;;  %v375_v20 = vand.u32 4294901760, %v1742_v58 }
  0x4d   : > { %1327 = vmatpush3.bf16.msra.mxu0 %v1784_v25  ;;  %1255 = vmatpush3.bf16.msra.mxu1 %v1784_v25  ;;  %v349_v10 = vand.u32 4294901760, %v348_v5  ;;  %v356_v40 = vand.u32 4294901760, %v355_v6  ;;  %v382_v21 = vand.u32 4294901760, %v1750_v59  ;;  %v1287_v62 = vpack.c.bf16 %v1663_v18, %v1661_v17 }
  0x4e   : > { %1328 = vmatprep.subr.bf16.mxu0 %v1549_v1  ;;  %1256 = vmatprep.subr.bf16.mxu1 %v1549_v1  ;;  %v1275_v7 = vpack.c.bf16 %v342_v49, %v335_v0  ;;  %v1353_v11 = vpack.c.bf16 %v368_v50, %v361_v44  ;;  %v362_v12 = vsub.f32 %v1727_v51, %v361_v44  ;;  %v159_v18 = vlaneseq }
  0x4f   : > { %v1278_v52 = vpack.c.bf16 %v356_v40, %v349_v10  ;;  %v369_v13 = vsub.f32 %v1737_v57, %v368_v50  ;;  %v1356_v26 = vpack.c.bf16 %v382_v21, %v375_v20  ;;  %v376_v30 = vsub.f32 %v1742_v58, %v375_v20 }
  0x50   : > { %v363_v15 = vand.u32 4294901760, %v362_v12  ;;  %v383_v31 = vsub.f32 %v1750_v59, %v382_v21  ;;  %v1290_v63 = vpack.c.bf16 %v1671_v24, %v1669_v23  ;;  %v1293_v0 = vpack.c.bf16 %v1689_v35, %v1680_v29 }
  0x51   : > { %1330 = vmatpush3.bf16.msra.mxu0 %v1800_v54  ;;  %1258 = vmatpush3.bf16.msra.mxu1 %v1800_v54  ;;  %v370_v22 = vand.u32 4294901760, %v369_v13  ;;  %v377_v39 = vand.u32 4294901760, %v376_v30  ;;  %v1296_v2 = vpack.c.bf16 %v1699_v41, %v1691_v36  ;;  %v1299_v34 = vpack.c.bf16 %v1705_v43, %v1702_v42 }
  0x52   : > { %1331 = vmatprep.subr.bf16.mxu0 %v1549_v1  ;;  %1259 = vmatprep.subr.bf16.mxu1 %v1549_v1  ;;  %v384_v37 = vand.u32 4294901760, %v383_v31  ;;  %v1302_v49 = vpack.c.bf16 %v1716_v47, %v1713_v46  ;;  %v1305_v5 = vpack.c.bf16 %v1737_v57, %v1727_v51  ;;  %v1308_v17 = vpack.c.bf16 %v1750_v59, %v1742_v58 }
  0x53   : > { %v1281_v33 = vpack.c.bf16 %v370_v22, %v363_v15  ;;  %v1855_v6 = vand.u32 127, %v159_v18 }
  0x54   : > { %v1284_v38 = vpack.c.bf16 %v384_v37, %v377_v39 }
  0x55   : > { %1333 = vmatpush3.bf16.msra.mxu0 %v1818_v48  ;;  %1261 = vmatpush3.bf16.msra.mxu1 %v1818_v48 }
  0x56   : > { %1334 = vmatprep.subr.bf16.mxu0 %v1549_v1  ;;  %1262 = vmatprep.subr.bf16.mxu1 %v1549_v1 }
  0xbe   : > { %v1857_v10 = vpop.permute.xlu0 %162 }
  0xbf   : > { %vm164_vm3 = vcmp.eq.s32.totalorder %v1857_v10, %v1855_v6 }
  0xc0   : > { %v918_v40 = vsel %vm164_vm3, 1.0, %v1551_v53 }
  0xc1   : > { %v1865_v44 = vsub.f32 %v918_v40, %v918_v40 }
  0xc3   : > { %v266_v50 = vand.u32 4294901760, %v1865_v44 }
  0xc5   : > { %1166 = vmatmul.mubr.f32.vlgmr.msra.gmra.mrb[0].mxu0 %v266_v50  ;;  %v267_v12 = vsub.f32 %v1865_v44, %v266_v50 }
  0xc6   : > { %1336 = vmatpush3.bf16.msra.mxu0 %v1752_v60  ;;  %1200 = vmatprep.mubr.msk.f32.mxu0 %vm1550_vm2, %v1551_v53  ;;  %v1552_v60 = vmov 1.0  }
  0xc7   : > { %1337 = vmatprep.subr.bf16.mxu0 %v1549_v1  ;;  %v268_v13 = vand.u32 4294901760, %v267_v12 }
  0xc9   : > { %1061 = vmatmul.mubr.f32.vlgmr.msra.gmra.mrb[0].mxu1 %v268_v13 }
  0xca   : > { %1264 = vmatpush3.bf16.msra.mxu1 %v1769_v9  ;;  %1339 = vmatpush3.bf16.msra.mxu0 %v1761_v4 }
  0xcb   : > { %1265 = vmatprep.subr.bf16.mxu1 %v1549_v1  ;;  %1340 = vmatprep.subr.bf16.mxu0 %v1549_v1 }
  0xcc   : > { %1095 = vmatprep.mubr.msk.f32.mxu1 %vm1550_vm2, %v1551_v53 }
  0xce   : > { %1267 = vmatpush3.bf16.msra.mxu1 %v1779_v19  ;;  %1342 = vmatpush3.bf16.msra.mxu0 %v1776_v14 }
  0xcf   : > { %1268 = vmatprep.subr.bf16.mxu1 %v1549_v1  ;;  %1343 = vmatprep.subr.bf16.mxu0 %v1549_v1 }
  0xd2   : > { %1270 = vmatpush3.bf16.msra.mxu1 %v1793_v32  ;;  %1345 = vmatpush3.bf16.msra.mxu0 %v1788_v28 }
  0xd3   : > { %1271 = vmatprep.subr.bf16.mxu1 %v1549_v1  ;;  %1346 = vmatprep.subr.bf16.mxu0 %v1549_v1 }
  0xd6   : > { %1273 = vmatpush3.bf16.msra.mxu1 %v1804_v55  ;;  %1348 = vmatpush3.bf16.msra.mxu0 %v1806_v61 }
  0xd7   : > { %1274 = vmatprep.subr.bf16.mxu1 %v1549_v1  ;;  %1349 = vmatprep.subr.bf16.mxu0 %v1549_v1 }
  0xda   : > { %1276 = vmatpush3.bf16.msra.mxu1 %v1275_v7  ;;  %1351 = vmatpush3.bf16.msra.mxu0 %v1822_v3 }
  0xdb   : > { %1277 = vmatprep.subr.bf16.mxu1 %v1549_v1  ;;  %1352 = vmatprep.subr.bf16.mxu0 %v1549_v1 }
  0xde   : > { %1279 = vmatpush3.bf16.msra.mxu1 %v1278_v52  ;;  %1354 = vmatpush3.bf16.msra.mxu0 %v1353_v11 }
  0xdf   : > { %1280 = vmatprep.subr.bf16.mxu1 %v1549_v1  ;;  %1355 = vmatprep.subr.bf16.mxu0 %v1549_v1 }
  0xe2   : > { %1282 = vmatpush3.bf16.msra.mxu1 %v1281_v33  ;;  %1357 = vmatpush3.bf16.msra.mxu0 %v1356_v26 }
  0xe3   : > { %1283 = vmatprep.subr.bf16.mxu1 %v1549_v1  ;;  %1358 = vmatprep.subr.bf16.mxu0 %v1549_v1 }
  0xe5   : > { %1201 = vmatmul.mubr.msk.f32.vlgmr.msra.gmra.mrb[0].mxu0 %vm164_vm3, %v1552_v60 }
  0xe6   : > { %1285 = vmatpush3.bf16.msra.mxu1 %v1284_v38  ;;  %1360 = vmatpush3.bf16.msra.mxu0 %v1659_v16 }
  0xe7   : > { %1286 = vmatprep.subr.bf16.mxu1 %v1549_v1  ;;  %1361 = vmatprep.subr.bf16.mxu0 %v1549_v1 }
  0xe8   : > { %1235 = vmatprep.mubr.msk.f32.mxu0 %vm1550_vm2, %v1551_v53 }
  0xe9   : > { %1096 = vmatmul.mubr.msk.f32.vlgmr.msra.gmra.mrb[0].mxu1 %vm164_vm3, %v1552_v60 }
  0xea   : > { %1288 = vmatpush3.bf16.msra.mxu1 %v1287_v62  ;;  %1363 = vmatpush3.bf16.msra.mxu0 %v1678_v27 }
  0xeb   : > { %1289 = vmatprep.subr.bf16.mxu1 %v1549_v1  ;;  %1364 = vmatprep.subr.bf16.mxu0 %v1549_v1 }
  0xec   : > { %1130 = vmatprep.mubr.msk.f32.mxu1 %vm1550_vm2, %v1551_v53 }
  0xee   : > { %1291 = vmatpush3.bf16.msra.mxu1 %v1290_v63  ;;  %1366 = vmatpush3.bf16.msra.mxu0 %v1710_v45 }
  0xef   : > { %1292 = vmatprep.subr.bf16.mxu1 %v1549_v1  ;;  %1367 = vmatprep.subr.bf16.mxu0 %v1549_v1 }
  0xf2   : > { %1294 = vmatpush3.bf16.msra.mxu1 %v1293_v0  ;;  %1369 = vmatpush3.bf16.msra.mxu0 %v1734_v56 }
  0xf3   : > { %1295 = vmatprep.subr.bf16.mxu1 %v1549_v1  ;;  %1370 = vmatprep.subr.bf16.mxu0 %v1549_v1 }
  0xf6   : > { %1297 = vmatpush3.bf16.msra.mxu1 %v1296_v2  ;;  %1372 = vmatpush3.bf16.msra.mxu0 %v1767_v8 }
  0xf7   : > { %1298 = vmatprep.subr.bf16.mxu1 %v1549_v1  ;;  %1373 = vmatprep.subr.bf16.mxu0 %v1549_v1 }
  0xfa   : > { %1300 = vmatpush3.bf16.msra.mxu1 %v1299_v34  ;;  %1375 = vmatpush3.bf16.msra.mxu0 %v1784_v25 }
  0xfb   : > { %1301 = vmatprep.subr.bf16.mxu1 %v1549_v1  ;;  %1376 = vmatprep.subr.bf16.mxu0 %v1549_v1 }
  0xfe   : > { %1303 = vmatpush3.bf16.msra.mxu1 %v1302_v49  ;;  %1378 = vmatpush3.bf16.msra.mxu0 %v1800_v54 }
  0xff   : > { %1304 = vmatprep.subr.bf16.mxu1 %v1549_v1  ;;  %1379 = vmatprep.subr.bf16.mxu0 %v1549_v1 }
 0x102   : > { %1306 = vmatpush3.bf16.msra.mxu1 %v1305_v5  ;;  %1381 = vmatpush3.bf16.msra.mxu0 %v1818_v48 }
 0x103   : > { %1307 = vmatprep.subr.bf16.mxu1 %v1549_v1 }
 0x105   : > { %1236 = vmatmul.mubr.msk.f32.vlgmr.msra.gmra.mrb[0].mxu0 %vm164_vm3, %v1552_v60 }
 0x106   : > { %1309 = vmatpush3.bf16.msra.mxu1 %v1308_v17 }
 0x109   : > { %1131 = vmatmul.mubr.f32.vlgmr.msra.gmra.mrb[0].mxu1 %v1865_v44 }
 0x1d8   : > { %v820_v16 = vpop.f32.mrb[0].mxu0 }
 0x1d9   : > { %v1237_v23 = vpop.f32.mrb[1].mxu0 }
 0x1dc   : > { %v525_v24 = vpop.f32.mrb[0].mxu1 }
 0x1dd   : > { %v1382_v1 = vadd.f32 %v820_v16, %v525_v24  ;;  %v1132_v27 = vpop.f32.mrb[1].mxu1 }
 0x1df   : > { %824 = vst [vmem:[%s149_s26] sm:$0xff] %v1382_v1 }
 0x1e0   : > { %1490 = shalt.err (!%p1487_p7)
}
 0x1e1   : > { %s1491_s7 = scalar_lea.hbm %s1961_s30, 128  ;;  %s1495_s16 = scalar_lea.hbm %s2005_s2, 256 }
 0x1e2   : > { %p1492_p8 = scmp.ne.s32.totalorder %s1961_s30, %s1491_s7  ;;  %p1496_p1 = scmp.lt.u32.totalorder %s1961_s30, %s2005_s2 }
 0x1e3   : > { %p1497_p0 = scmp.lt.u32.totalorder %s1495_s16, %s1491_s7  ;;  %p1499_p6 = scmp.lt.u32.totalorder %s1491_s7, %s1961_s30 }
 0x1e4   : > { %p1493_p11 = pnand %p1492_p8, %p2016_p9 }
 0x1e5   : > { %p1498_p5 = por %p1497_p0, %p1496_p1 }
 0x1e6   : > { %p1494_p13 = pneg %p1493_p11 }
 0x1e7   : > { %p1500_p10 = por %p1499_p6, %p1498_p5 }
 0x1e9   : > { %p1501_p12 = pnand %p1500_p10, %p1494_p13 }
 0x1eb   : > { %1504 = shalt.err (!%p1501_p12)
}
 0x1ec   : > { %1395 = dma.vmem_to_hbm [thread:$0]  (%p2016_p9), %s1963_s27, 128, %s1961_s30, %s826_s3  }
 0x1ed PF: > { %p1407_p2 = scmp.ge.s32.totalorder %s1543_s12, 2  ;;  %s851_s22 = sand.u32 1, %s1531_s9  }
 0x1ee   : > { %p2017_p3 = scmp.ne.s32.totalorder %s2010_s20, 0  ;;  %s852_s23 = scalar_lea.sflag [#allocation4], %s851_s22 }
 0x1f0   : > { %p1402_p4 = pnand %p1407_p2, %p2017_p3 }
 0x1f2   : > { %1526 = dma.done.wait (!%p1402_p4), %s852_s23, 128  }
 0x1f3   : > { %1528 = vsyncadd (!%p1402_p4), %s852_s23, 4294967168  ;;  %p13_p7 = scmp.ge.s32.totalorder %s1594_s15, 4   ;;  %s2018_s9 = smov %s1535_s10 }
 0x1f4   : > { %s2019_s10 = smov %s1539_s11  ;;  %s2020_s11 = smov %s1605_s18 }
 0x1f5   : > { %s2021_s12 = smov %s1594_s15  ;;  %15 = sbr.rel (!%p13_p7) target bundleno = 4 (0x4), region = 68 }
 0x1fc   :  { %857 = vsyncpa [#allocation3], 1 }
 0x1fd   :  { %859 = vsyncpa [#allocation3 + $0x1], 1 }
 0x1fe   :  { %860 = vsyncpa [#allocation4], 1 }
 0x1ff   :  { %862 = vsyncpa [#allocation4 + $0x1], 1 }

</bundles_post_ra>
